<compile_context>
chip_gen: v6e
topology: v6e:2x2x1
jax: 0.10.0
libtpu: 0.0.40
codegen_flags: <defaults>
</compile_context>

<pallas_src>
import functools

import jax
import jax.numpy as jnp
from jax import lax
from jax.experimental import pallas as pl
from jax.experimental.pallas import tpu as pltpu


def _cam_kernel(xcol_ref, wc_ref, wo_ref, bo_ref, o_ref, *, C, HW):
    # xcol_ref: (9C+1, HW)  im2col patches for THIS batch + ones row (conv bias folded)
    # wc_ref  : (C, 9C+1)   conv weight flattened (OIHW -> (C_out, C_in*9)) + bias col
    # wo_ref  : (HW, HW)    fc_o weight, pre-transposed to (in, out), fully resident
    # bo_ref  : (1, HW)     fc_o bias
    # o_ref   : (1, C, HW)  this batch's output block
    xcol = xcol_ref[...]
    wc = wc_ref[...]

    # ---- 3x3 "same" conv (+ bias) as ONE MXU GEMM: (C, 9C+1) @ (9C+1, HW) ----
    y = jnp.dot(wc, xcol, preferred_element_type=jnp.float32)          # (C, HW)

    # ---- channel attention: (C, C) softmax over d_k = HW (h = 1 head) ----
    scale = 1.0 / jnp.sqrt(jnp.float32(HW))
    # last-dim/last-dim contraction: no explicit transpose of y
    s = lax.dot_general(y, y, (((1,), (1,)), ((), ())),
                        preferred_element_type=jnp.float32) * scale     # (C, C)
    m = jnp.max(s, axis=-1, keepdims=True)
    e = jnp.exp(s - m)
    denom = jnp.sum(e, axis=-1, keepdims=True)
    # exact reciprocal keeps the 1e-4 check tight; approx=True would move the
    # divide onto the free EUP slot if a looser tolerance is acceptable.
    p = e * pl.reciprocal(denom, approx=False)
    att = jnp.dot(p, y, preferred_element_type=jnp.float32)             # (C, HW)

    # ---- fc_o GEMM on the pre-transposed weight (no in-kernel wo.T) ----
    out = jnp.dot(att, wo_ref[...], preferred_element_type=jnp.float32) + bo_ref[...]
    o_ref[0] = out.astype(o_ref.dtype)


def channel_attention_module(x, conv_w, conv_b, fc_w, fc_b):
    """x: (B, C, H, W) float32 NCHW.  Returns (B, C, H*W) float32."""
    B, C, H, W = x.shape
    HW = H * W
    KH, KW = conv_w.shape[2], conv_w.shape[3]
    pad = (KH - 1) // 2

    # ---- wrapper-side im2col (lane-dense slab, batch-major columns) ----
    x_pad = jnp.pad(x, ((0, 0), (0, 0), (pad, pad), (pad, pad)))
    patches = jnp.stack(
        [x_pad[:, :, di:di + H, dj:dj + W] for di in range(KH) for dj in range(KW)],
        axis=2)                                        # (B, C, KH*KW, H, W)
    x_col = patches.reshape(B, C * KH * KW, HW)        # k = c_in*9 + (di*3+dj)
    x_col = x_col.transpose(1, 0, 2).reshape(C * KH * KW, B * HW)
    # ones row folds the conv bias into the GEMM (no (C,1) VMEM bias block)
    x_col = jnp.concatenate([x_col, jnp.ones((1, B * HW), x.dtype)], axis=0)

    wc = jnp.concatenate(
        [conv_w.reshape(C, C * KH * KW), conv_b.reshape(C, 1)], axis=1)  # (C, 9C+1)
    wo_t = fc_w.T                 # (HW_in, HW_out): pre-transposed once in XLA
    bo = fc_b.reshape(1, HW)

    K = C * KH * KW + 1

    kernel = functools.partial(_cam_kernel, C=C, HW=HW)
    out = pl.pallas_call(
        kernel,
        out_shape=jax.ShapeDtypeStruct((B, C, HW), x.dtype),
        grid_spec=pltpu.PrefetchScalarGridSpec(
            num_scalar_prefetch=0,
            grid=(B,),                                          # one step per batch
            in_specs=[
                pl.BlockSpec((K, HW), lambda b: (0, b)),        # this batch's im2col cols
                pl.BlockSpec((C, K), lambda b: (0, 0)),         # conv weight (resident)
                pl.BlockSpec((HW, HW), lambda b: (0, 0)),       # fc_o weight (resident)
                pl.BlockSpec((1, HW), lambda b: (0, 0)),        # fc_o bias (resident)
            ],
            out_specs=pl.BlockSpec((1, C, HW), lambda b: (b, 0, 0)),
        ),
        compiler_params=pltpu.CompilerParams(
            # independent batches -> megacore-shardable on v7x; single-TC chips
            # just run B small steps with no redundant prologue work.
            dimension_semantics=("parallel",),
        ),
    )(x_col, wc, wo_t, bo)
    return out


def _reference(x, conv_w, conv_b, fc_w, fc_b):
    """Pure-JAX reference of the PyTorch forward (eval mode)."""
    B, C, H, W = x.shape
    y = jax.lax.conv_general_dilated(
        x, conv_w, window_strides=(1, 1), padding="SAME",
        dimension_numbers=("NCHW", "OIHW", "NCHW"),
    ) + conv_b[None, :, None, None]
    yf = y.reshape(B, C, H * W)
    att = jnp.einsum("bcd,bed->bce", yf, yf) / jnp.sqrt(jnp.float32(H * W))
    att = jax.nn.softmax(att, axis=-1)
    out = jnp.einsum("bce,bed->bcd", att, yf)
    return out @ fc_w.T + fc_b[None, None, :]


if __name__ == "__main__":
    B, C, H, W = 2, 4, 16, 16   # d_model (channels) = 4, spatial 16x16 -> HW = 256
    HW = H * W

    key = jax.random.PRNGKey(0)
    kx, kcw, kcb, kfw, kfb = jax.random.split(key, 5)
    x = jax.random.normal(kx, (B, C, H, W), dtype=jnp.float32)
    conv_w = jax.random.normal(kcw, (C, C, 3, 3), dtype=jnp.float32) * 0.1
    conv_b = jax.random.normal(kcb, (C,), dtype=jnp.float32) * 0.1
    fc_w = jax.random.normal(kfw, (HW, HW), dtype=jnp.float32) * 0.05
    fc_b = jax.random.normal(kfb, (HW,), dtype=jnp.float32) * 0.05

    out = channel_attention_module(x, conv_w, conv_b, fc_w, fc_b)
    out = jax.block_until_ready(out)

    ref = jax.block_until_ready(_reference(x, conv_w, conv_b, fc_w, fc_b))
    assert out.shape == (B, C, HW)
    assert jnp.allclose(out, ref, rtol=1e-4, atol=1e-4), float(
        jnp.max(jnp.abs(out - ref))
    )
    print("KERNEL_OK")
</pallas_src>

<mosaic_0001>
module attributes {stable_mosaic.version = 11 : i64} {
  func.func @_cam_kernel(%arg0: i32, %arg1: memref<37x256xf32, #tpu.memory_space<vmem>>, %arg2: memref<4x37xf32, #tpu.memory_space<vmem>>, %arg3: memref<256x256xf32, #tpu.memory_space<vmem>>, %arg4: memref<1x256xf32, #tpu.memory_space<vmem>>, %arg5: memref<1x4x256xf32, #tpu.memory_space<vmem>>) attributes {dimension_semantics = [#tpu.dimension_semantics<parallel>], iteration_bounds = array<i64: 2>, scalar_prefetch = 0 : i64, scratch_operands = 0 : i64, tpu.core_type = #tpu.core_type<tc>, window_params = [{transform_indices = @transform_0, window_bounds = array<i64: 37, 256>}, {pipeline_mode = #tpu.pipeline_mode<synchronous>, transform_indices = @transform_1, window_bounds = array<i64: 4, 37>}, {pipeline_mode = #tpu.pipeline_mode<synchronous>, transform_indices = @transform_2, window_bounds = array<i64: 256, 256>}, {pipeline_mode = #tpu.pipeline_mode<synchronous>, transform_indices = @transform_3, window_bounds = array<i64: 1, 256>}, {transform_indices = @transform_4, window_bounds = array<i64: 1, 4, 256>}]} {
    %c0 = arith.constant 0 : index
    %c0_0 = arith.constant 0 : index
    %0 = vector.load %arg1[%c0, %c0_0] : memref<37x256xf32, #tpu.memory_space<vmem>>, vector<37x256xf32>
    %c0_1 = arith.constant 0 : index
    %c0_2 = arith.constant 0 : index
    %1 = vector.load %arg2[%c0_1, %c0_2] : memref<4x37xf32, #tpu.memory_space<vmem>>, vector<4x37xf32>
    %cst = arith.constant dense<0.000000e+00> : vector<4x256xf32>
    %2 = tpu.matmul %1, %0, %cst {dimension_numbers = #tpu.dot_dimension_numbers<[1], [0], [0], [1], [0, 0, 1, 1], [], []>} : vector<4x37xf32>, vector<37x256xf32>, vector<4x256xf32> -> vector<4x256xf32>
    %cst_3 = arith.constant 2.560000e+02 : f32
    %3 = math.sqrt %cst_3 : f32
    %cst_4 = arith.constant 1.000000e+00 : f32
    %4 = arith.divf %cst_4, %3 : f32
    %cst_5 = arith.constant dense<0.000000e+00> : vector<4x4xf32>
    %5 = tpu.matmul %2, %2, %cst_5 {dimension_numbers = #tpu.dot_dimension_numbers<[1], [1], [0], [0], [0, 0, 1, 0], [], []>} : vector<4x256xf32>, vector<4x256xf32>, vector<4x4xf32> -> vector<4x4xf32>
    %6 = vector.broadcast %4 : f32 to vector<4x4xf32>
    %7 = arith.mulf %5, %6 : vector<4x4xf32>
    %cst_6 = arith.constant dense<0xFF800000> : vector<4xf32>
    %8 = vector.multi_reduction <maximumf>, %7, %cst_6 [1] : vector<4x4xf32> to vector<4xf32>
    %9 = vector.shape_cast %8 : vector<4xf32> to vector<4x1xf32>
    %10 = vector.broadcast %9 : vector<4x1xf32> to vector<4x4xf32>
    %11 = arith.subf %7, %10 : vector<4x4xf32>
    %12 = math.exp %11 : vector<4x4xf32>
    %cst_7 = arith.constant dense<0.000000e+00> : vector<4xf32>
    %13 = vector.multi_reduction <add>, %12, %cst_7 [1] : vector<4x4xf32> to vector<4xf32>
    %14 = vector.shape_cast %13 : vector<4xf32> to vector<4x1xf32>
    %15 = tpu.reciprocal %14 : vector<4x1xf32> -> vector<4x1xf32>
    %16 = vector.broadcast %15 : vector<4x1xf32> to vector<4x4xf32>
    %17 = arith.mulf %12, %16 : vector<4x4xf32>
    %cst_8 = arith.constant dense<0.000000e+00> : vector<4x256xf32>
    %18 = tpu.matmul %17, %2, %cst_8 {dimension_numbers = #tpu.dot_dimension_numbers<[1], [0], [0], [1], [0, 0, 1, 1], [], []>} : vector<4x4xf32>, vector<4x256xf32>, vector<4x256xf32> -> vector<4x256xf32>
    %c0_9 = arith.constant 0 : index
    %c0_10 = arith.constant 0 : index
    %19 = vector.load %arg3[%c0_9, %c0_10] : memref<256x256xf32, #tpu.memory_space<vmem>>, vector<256x256xf32>
    %cst_11 = arith.constant dense<0.000000e+00> : vector<4x256xf32>
    %20 = tpu.matmul %18, %19, %cst_11 {dimension_numbers = #tpu.dot_dimension_numbers<[1], [0], [0], [1], [0, 0, 1, 1], [], []>} : vector<4x256xf32>, vector<256x256xf32>, vector<4x256xf32> -> vector<4x256xf32>
    %c0_12 = arith.constant 0 : index
    %c0_13 = arith.constant 0 : index
    %21 = vector.load %arg4[%c0_12, %c0_13] : memref<1x256xf32, #tpu.memory_space<vmem>>, vector<1x256xf32>
    %22 = vector.broadcast %21 : vector<1x256xf32> to vector<4x256xf32>
    %23 = arith.addf %20, %22 : vector<4x256xf32>
    %c0_14 = arith.constant 0 : index
    %c0_15 = arith.constant 0 : index
    %c0_16 = arith.constant 0 : index
    %24 = vector.load %arg5[%c0_14, %c0_15, %c0_16] : memref<1x4x256xf32, #tpu.memory_space<vmem>>, vector<1x4x256xf32>
    %25 = vector.shape_cast %24 : vector<1x4x256xf32> to vector<4x256xf32>
    %26 = vector.shape_cast %23 : vector<4x256xf32> to vector<1x4x256xf32>
    tpu.vector_store %arg5[%c0_14, %c0_15, %c0_16], %26 {strides = array<i32>} : memref<1x4x256xf32, #tpu.memory_space<vmem>>, vector<1x4x256xf32>,
    return
  }
  func.func @transform_0(%arg0: i32) -> (i32, i32) {
    %c0_i32 = arith.constant 0 : i32
    %c0_i32_0 = arith.constant 0 : i32
    return %c0_i32, %arg0 : i32, i32
  }
  func.func @transform_1(%arg0: i32) -> (i32, i32) {
    %c0_i32 = arith.constant 0 : i32
    %c0_i32_0 = arith.constant 0 : i32
    %c0_i32_1 = arith.constant 0 : i32
    return %c0_i32, %c0_i32_0 : i32, i32
  }
  func.func @transform_2(%arg0: i32) -> (i32, i32) {
    %c0_i32 = arith.constant 0 : i32
    %c0_i32_0 = arith.constant 0 : i32
    %c0_i32_1 = arith.constant 0 : i32
    return %c0_i32, %c0_i32_0 : i32, i32
  }
  func.func @transform_3(%arg0: i32) -> (i32, i32) {
    %c0_i32 = arith.constant 0 : i32
    %c0_i32_0 = arith.constant 0 : i32
    %c0_i32_1 = arith.constant 0 : i32
    return %c0_i32, %c0_i32_0 : i32, i32
  }
  func.func @transform_4(%arg0: i32) -> (i32, i32, i32) {
    %c0_i32 = arith.constant 0 : i32
    %c0_i32_0 = arith.constant 0 : i32
    %c0_i32_1 = arith.constant 0 : i32
    return %arg0, %c0_i32, %c0_i32_0 : i32, i32, i32
  }
}

</mosaic_0001>

<bundles_post_ra>
// kernel: tpu_custom_call.1
= control target key start
LH: loop header
LB: loop body
LE: loop exit
PB: predicated region body
PF: predicated region fallthrough
CT: control target
= control target key end

     0   :  { %s1233_s0 = inlined_call_operand.hbm [shape: f32[37,512], index: 0, kind: input, shape index: {}]   ;;  %s1234_s1 = inlined_call_operand.hbm [shape: f32[4,37], index: 1, kind: input, shape index: {}]   ;;  %s1235_s2 = inlined_call_operand.hbm [shape: f32[256,256], index: 2, kind: input, shape index: {}]   ;;  %s1236_s3 = inlined_call_operand.vmem [shape: f32[1,256], index: 3, kind: input, shape index: {}]   ;;  %s1237_s4 = inlined_call_operand.hbm [shape: f32[2,4,256], index: 4, kind: output, shape index: {}]  }
   0x1   :  { %1242 = sst [smem:[#allocation12_spill]] %s1234_s1 }
   0x2   :  { %9 = vsyncpa [#allocation3], 0 }
   0x3   :  { %11 = vsyncpa [#allocation3 + $0x1], 0 }
   0x4   :  { %12 = vsyncpa [#allocation6], 0 }
   0x5   :  { %13 = vsyncpa [#allocation4], 0 }
   0x6   :  { %15 = vsyncpa [#allocation4 + $0x1], 0  ;;  %s1042_s15 = smov 0   ;;  %s1044_s16 = smov 0  }
   0x7   :  { %s1046_s17 = smov 0   ;;  %s1048_s18 = smov 0  }
   0x8 LB: > { %s1063_s19 = sadd.s32 4294967295, %s1007_s18   ;;  %s758_s20 = sadd.s32 4294967294, %s1007_s18   ;;  %s1007_s18 = sphi %s1048_s18, %s1262_s18   ;;  %s1003_s17 = sphi %s1046_s17, %s1261_s17   ;;  %s999_s16 = sphi %s1044_s16, %s1260_s16   ;;  %s995_s15 = sphi %s1042_s15, %s1259_s15  }
   0x9   : > { %s1067_s21 = sadd.s32 1, %s1007_s18   ;;  %s28_s22 = sadd.s32 1, %s1003_s17 }
   0xa   : > { %s25_s23 = ssub.s32 %s1007_s18, %s1067_s21  ;;  %p35_p0 = scmp.ne.s32.totalorder %s1003_s17, %s999_s16 }
   0xb   : > { %p26_p1 = scmp.eq.s32.totalorder %s25_s23, 0  ;;  %p36_p2 = scmp.eq.s32.totalorder %s1007_s18, 0 }
   0xc   : > { %p41_p3 = scmp.ne.s32.totalorder %s999_s16, %s995_s15  ;;  %p1238_p4 = scmp.eq.s32.totalorder %s1063_s19, 0 }
   0xd   : > { %s1079_s24 = scalar_select %p26_p1, %s1003_s17, %s28_s22  }
   0xe   : > { %p1081_p5 = por %p36_p2, %p35_p0  ;;  %p1087_p6 = por %p1238_p4, %p41_p3 }
   0xf   : > { %p128_p7 = scmp.eq.s32.totalorder %s1063_s19, 1  ;;  %p134_p8 = scmp.eq.s32.totalorder %s758_s20, 1 }
  0x10   : > { %s1244_s26 = scalar_select %p1087_p6, 1, 0 }
  0x11   : > { %p759_p9 = scmp.ge.s32.totalorder %s1007_s18, 1  ;;  %p141_p10 = scmp.lt.s32.totalorder %s1007_s18, 3 }
  0x12   : > { %p1094_p11 = por %p128_p7, %p35_p0  ;;  %p1098_p12 = por %p134_p8, %p41_p3 }
  0x13   : > { %p1102_p13 = pnand %p759_p9, %p141_p10  ;;  %s1009_s30 = smov [#allocation5]  }
  0x14   : > { %s1245_s27 = scalar_select %p1094_p11, 1, 0 }
  0x15   : > { %s1246_s28 = scalar_select %p1098_p12, 1, 0 }
  0x16   : > { %s1247_s29 = scalar_select %p1102_p13, 1, 0 }
  0x17   : > { %p796_p2 = pneg %p1102_p13  ;;  %s154_s5 = sshll.u32 %s1009_s30, 4  ;;  %s155_s5 = int_to_ptr.vmem [resolvable:$true] %s154_s5 }
  0x18   : > { %p813_p4 = scmp.lt.s32.totalorder %s1007_s18, 2  ;;  %p1248_p0 = scmp.eq.s32.totalorder %s1063_s19, 0 }
  0x19   : > { %s1010_s8 = smov [#allocation7]   ;;  %s870_s10 = scalar_lea.vmem %s155_s5, 64 }
  0x1a   : > { %p1112_p7 = pnand %p796_p2, %p1248_p0  ;;  %p1118_p3 = pnand %p813_p4, %p1081_p5 }
  0x1b   : > { %s164_s9 = sshll.u32 %s1010_s8, 4  ;;  %p871_p9 = scmp.ne.s32.totalorder %s155_s5, %s870_s10  ;;  %s165_s9 = int_to_ptr.vmem [resolvable:$true] %s164_s9 }
  0x1c   : > { %p861_p8 = pneg %p1112_p7  ;;  %p878_p0 = scmp.lt.s32.totalorder %s155_s5, %s155_s5 }
  0x1d   : > { %p879_p1 = scmp.lt.s32.totalorder %s870_s10, %s870_s10 }
  0x1e   : > { %p873_p10 = pnand %p871_p9, %p861_p8 }
  0x1f   : > { %p880_p12 = por %p879_p1, %p878_p0 }
  0x20   : > { %p874_p2 = pneg %p873_p10 }
  0x22   : > { %p881_p11 = pnand %p880_p12, %p874_p2 }
  0x24   : > { %884 = shalt.err (!%p881_p11)
}
  0x25   : > { %s1251_s1 = sld [smem:[#allocation12_spill]]  ;;  %s181_s13 = sand.u32 1, %s1003_s17  }
  0x26   : > { %s896_s14 = scalar_lea.vmem %s165_s9, 8192  ;;  %p904_p10 = scmp.lt.s32.totalorder %s165_s9, %s165_s9 }
  0x27   : > { %p897_p4 = scmp.ne.s32.totalorder %s165_s9, %s896_s14  ;;  %p905_p6 = scmp.lt.s32.totalorder %s896_s14, %s896_s14 }
  0x29   : > { %p899_p5 = pnand %p897_p4, %p861_p8  ;;  %p906_p1 = por %p905_p6, %p904_p10 }
  0x2b   : > { %799 = dma.hbm_to_vmem [thread:$0]  (!%p1112_p7), %s1251_s1, 64, %s155_s5, [#allocation6]  }
  0x2c   : > { %p900_p9 = pneg %p899_p5 }
  0x2e   : > { %p907_p12 = pnand %p906_p1, %p900_p9 }
  0x30   : > { %910 = shalt.err (!%p907_p12)
}
  0x31   : > { %s1011_s20 = smov 256   ;;  %s1012_s22 = smov 16  }
  0x32   : > { %802 = dma.hbm_to_vmem [thread:$0]  (!%p1112_p7), %s1235_s2, 8192, %s165_s9, [#allocation6], %s1011_s20, %s1011_s20, %s1012_s22  }
  0x33   : > { %s782_s30 = smul.u32 80, %s181_s13  ;;  %s780_s5 = sshll.u32 %s1007_s18, 8 }
  0x34   : > { %s1148_s11 = scalar_lea.hbm %s1233_s0, %s780_s5  ;;  %s1152_s6 = scalar_lea.sflag [#allocation3], %s181_s13 }
  0x35   : > { %s185_s12 = scalar_lea.vmem [#allocation2], %s782_s30  ;;  %s911_s1 = scalar_lea.hbm %s1148_s11, 1280 }
  0x36   : > { %s192_s14 = sshll.u32 %s185_s12, 4  ;;  %p912_p6 = scmp.ne.s32.totalorder %s1148_s11, %s911_s1  ;;  %s1150_s14 = int_to_ptr.vmem [resolvable:$true] %s192_s14 }
  0x37   : > { %p913_p11 = pneg %p1118_p3  ;;  %s916_s25 = scalar_lea.hbm %s1233_s0, 2560 }
  0x38   : > { %p917_p2 = scmp.lt.s32.totalorder %s1148_s11, %s1233_s0  ;;  %p918_p0 = scmp.lt.s32.totalorder %s916_s25, %s911_s1 }
  0x39   : > { %p914_p7 = pnand %p913_p11, %p912_p6 }
  0x3a   : > { %p919_p4 = por %p918_p0, %p917_p2 }
  0x3b   : > { %p915_p8 = pneg %p914_p7 }
  0x3d   : > { %p920_p5 = pnand %p919_p4, %p915_p8 }
  0x3f   : > { %923 = shalt.err (!%p920_p5)
}
  0x40   : > { %s924_s13 = scalar_lea.vmem %s1150_s14, 1280  ;;  %s1013_s30 = smov [#allocation2]  }
  0x41   : > { %p925_p9 = scmp.ne.s32.totalorder %s1150_s14, %s924_s13  ;;  %s929_s10 = sshll.u32 %s1013_s30, 4  ;;  %s930_s10 = int_to_ptr.vmem [resolvable:$false] %s929_s10 }
  0x42   : > { %s931_s12 = scalar_lea.vmem %s930_s10, 2560  ;;  %p932_p12 = scmp.lt.s32.totalorder %s1150_s14, %s930_s10 }
  0x43   : > { %p927_p10 = pnand %p925_p9, %p913_p11  ;;  %p933_p6 = scmp.lt.s32.totalorder %s931_s12, %s924_s13 }
  0x45   : > { %p928_p1 = pneg %p927_p10  ;;  %p934_p7 = por %p933_p6, %p932_p12 }
  0x47   : > { %p935_p13 = pnand %p934_p7, %p928_p1 }
  0x49   : > { %938 = shalt.err (!%p935_p13)
}
  0x4a   : > { %s1014_s1 = smov 512   ;;  %p1252_p11 = scmp.ne.s32.totalorder %s1247_s29, 0 }
  0x4b   : > { %806 = dma.hbm_to_vmem [thread:$0]  (!%p1118_p3), %s1148_s11, 1280, %s1150_s14, %s1152_s6, %s1014_s1, %s1011_s20, %s1012_s22  }
  0x4c   : > { %204 = sbr.rel (%p1252_p11) target bundleno = 1210 (0x4ba), region = 36  ;;  %s1178_s9 = sand.u32 (!%p1252_p11), 1, %s999_s16  }
  0x4d   : > { %s783_s23 = smul.u32 (!%p1252_p11), 80, %s1178_s9  ;;  %s207_s25 = scalar_lea.sflag (!%p1252_p11), [#allocation3], %s1178_s9 }
  0x4e   : > { %p1253_p13 = scmp.ne.s32.totalorder (!%p1252_p11), %s1244_s26, 0 }
  0x4f   : > { %s210_s5 = scalar_lea.vmem (!%p1252_p11), [#allocation2], %s783_s23 }
  0x51   : > { %982 = dma.done.wait (%p1253_p13), %s207_s25, 1280  }
  0x52   : > { %984 = vsyncadd (%p1253_p13), %s207_s25, 4294966016  ;;  %p1254_p8 = scmp.eq.s32.totalorder %s1063_s19, 0 }
  0x54   : > { %986 = dma.done.wait (%p1254_p8), [#allocation6], 8256   ;;  %p1255_p3 = pmov %p1254_p8 }
  0x55   : > { %v1015_v0 = vmov 0.0   ;;  %vm259_vm0 = vcmask 1044480   ;;  %v253_v1 = vld [vmem:[%s210_s5 + $0x48] sm:$0x1f]  ;;  %v252_v2 = vld [vmem:[%s210_s5 + $0x40] sm:$0x1f] }
  0x56   : > { %988 = vsyncadd (%p1255_p3), [#allocation6], 4294959040  ;;  %330 = vmatprep.mubr.f32.mxu0 %v1015_v0  ;;  %v251_v3 = vld [vmem:[%s210_s5 + $0x38] sm:$0xff]  ;;  %769 = vmatprep.subr.msk.mxu0 %vm259_vm0, %v253_v1  ;;  %v250_v4 = vld [vmem:[%s210_s5 + $0x30] sm:$0xff]  ;;  %vm255_vm1 = vcmask 302080   ;;  %vm424_vm2 = vcmask 1043456  }
  0x57   : > { %770 = vmatpush1.msk.msra.mxu0 %vm259_vm0, %v252_v2  ;;  %v249_v5 = vld [vmem:[%s210_s5 + $0x28] sm:$0xff]  ;;  %v248_v6 = vld [vmem:[%s210_s5 + $0x20] sm:$0xff]  ;;  %v247_v7 = vld [vmem:[%s210_s5 + $0x18] sm:$0xff]  ;;  %vm408_vm3 = vcmask 27648   ;;  %vm420_vm4 = vcmask 31744   ;;  %s768_s7 = sshll.u32 %s1178_s9, 3 }
  0x58   : > { %290 = vmatprep.subr.mxu0 %v251_v3  ;;  %v246_v8 = vld [vmem:[%s210_s5 + $0x10] sm:$0xff]  ;;  %v245_v9 = vld [vmem:[%s210_s5 + $0x8] sm:$0xff]  ;;  %v244_v10 = vld [vmem:[%s210_s5] sm:$0xff]  ;;  %s781_s20 = sshll.u32 %s1063_s19, 7  ;;  %s242_s22 = scalar_lea.vmem [#allocation8], %s768_s7 }
  0x59   : > { %291 = vmatpush1.msra.mxu0 %v250_v4  ;;  %v254_v11 = vld [vmem:[#allocation5] sm:$0xf]  ;;  %v532_v24 = vld [vmem:[#allocation7 + $0xf0] sm:$0xff]  ;;  %v531_v25 = vld [vmem:[#allocation7 + $0xe8] sm:$0xff]  ;;  %s669_s11 = sshll.u32 %s242_s22, 4  ;;  %s667_s8 = scalar_lea.hbm %s1237_s4, %s781_s20  ;;  %s670_s11 = int_to_ptr.vmem [resolvable:$true] %s669_s11 }
  0x5a   : > { %292 = vmatprep.subr.mxu0 %v249_v5  ;;  %v533_v23 = vld [vmem:[#allocation7 + $0xf8] sm:$0xff]  ;;  %v530_v26 = vld [vmem:[#allocation7 + $0xe0] sm:$0xff]  ;;  %v528_v28 = vld [vmem:[#allocation7 + $0xd0] sm:$0xff]  ;;  %s655_s13 = scalar_lea.sflag [#allocation4], %s1178_s9  ;;  %s939_s30 = scalar_lea.vmem %s670_s11, 128 }
  0x5b   : > { %293 = vmatpush1.msra.mxu0 %v248_v6  ;;  %578 = vmatprep.subr.mxu1 %v533_v23  ;;  %v529_v27 = vld [vmem:[#allocation7 + $0xd8] sm:$0xff]  ;;  %v527_v29 = vld [vmem:[#allocation7 + $0xc8] sm:$0xff]  ;;  %v526_v30 = vld [vmem:[#allocation7 + $0xc0] sm:$0xff]  ;;  %p940_p2 = scmp.ne.s32.totalorder %s670_s11, %s939_s30  ;;  %p1256_p0 = scmp.ne.s32.totalorder %s1245_s27, 0 }
  0x5c   : > { %294 = vmatprep.subr.mxu0 %v247_v7  ;;  %579 = vmatpush1.msra.mxu1 %v532_v24  ;;  %v525_v31 = vld [vmem:[#allocation7 + $0xb8] sm:$0xff]  ;;  %v524_v32 = vld [vmem:[#allocation7 + $0xb0] sm:$0xff]  ;;  %v523_v33 = vld [vmem:[#allocation7 + $0xa8] sm:$0xff]  ;;  %s1016_s10 = smov [#allocation8]  }
  0x5d   : > { %295 = vmatpush1.msra.mxu0 %v246_v8  ;;  %580 = vmatprep.subr.mxu1 %v531_v25  ;;  %v522_v34 = vld [vmem:[#allocation7 + $0xa0] sm:$0xff]  ;;  %v521_v35 = vld [vmem:[#allocation7 + $0x98] sm:$0xff]  ;;  %v520_v36 = vld [vmem:[#allocation7 + $0x90] sm:$0xff]  ;;  %p941_p4 = pnand %p940_p2, %p1256_p0  ;;  %s943_s12 = sshll.u32 %s1016_s10, 4  ;;  %s944_s12 = int_to_ptr.vmem [resolvable:$false] %s943_s12 }
  0x5e   : > { %296 = vmatprep.subr.mxu0 %v245_v9  ;;  %581 = vmatpush1.msra.mxu1 %v530_v26  ;;  %v519_v37 = vld [vmem:[#allocation7 + $0x88] sm:$0xff]  ;;  %v518_v38 = vld [vmem:[#allocation7 + $0x80] sm:$0xff]  ;;  %v517_v39 = vld [vmem:[#allocation7 + $0x78] sm:$0xff]  ;;  %s945_s19 = scalar_lea.vmem %s944_s12, 256  ;;  %p946_p9 = scmp.lt.s32.totalorder %s670_s11, %s944_s12 }
  0x5f   : > { %297 = vmatpush1.msra.mxu0 %v244_v10  ;;  %582 = vmatprep.subr.mxu1 %v529_v27  ;;  %v516_v40 = vld [vmem:[#allocation7 + $0x70] sm:$0xff]  ;;  %v515_v41 = vld [vmem:[#allocation7 + $0x68] sm:$0xff]  ;;  %v514_v42 = vld [vmem:[#allocation7 + $0x60] sm:$0xff]  ;;  %p942_p5 = pneg %p941_p4  ;;  %p947_p10 = scmp.lt.s32.totalorder %s945_s19, %s939_s30 }
  0x60   : > { %771 = vmatmul.mubr.msk.f32.vlgmr.msra.gmra.mxu0 %vm255_vm1, %v254_v11  ;;  %583 = vmatpush1.msra.mxu1 %v528_v28  ;;  %v513_v43 = vld [vmem:[#allocation7 + $0x58] sm:$0xff]  ;;  %v512_v44 = vld [vmem:[#allocation7 + $0x50] sm:$0xff]  ;;  %v511_v45 = vld [vmem:[#allocation7 + $0x48] sm:$0xff] }
  0x61   : > { %584 = vmatprep.subr.mxu1 %v527_v29  ;;  %v510_v46 = vld [vmem:[#allocation7 + $0x40] sm:$0xff]  ;;  %v509_v47 = vld [vmem:[#allocation7 + $0x38] sm:$0xff]  ;;  %v508_v48 = vld [vmem:[#allocation7 + $0x30] sm:$0xff]  ;;  %v568_v29 = vlaneseq  ;;  %p948_p1 = por %p947_p10, %p946_p9 }
  0x62   : > { %585 = vmatpush1.msra.mxu1 %v526_v30  ;;  %v507_v49 = vld [vmem:[#allocation7 + $0x28] sm:$0xff]  ;;  %v506_v50 = vld [vmem:[#allocation7 + $0x20] sm:$0xff]  ;;  %v505_v51 = vld [vmem:[#allocation7 + $0x18] sm:$0xff] }
  0x63   : > { %586 = vmatprep.subr.mxu1 %v525_v31  ;;  %v504_v52 = vld [vmem:[#allocation7 + $0x10] sm:$0xff]  ;;  %v503_v53 = vld [vmem:[#allocation7 + $0x8] sm:$0xff]  ;;  %v502_v54 = vld [vmem:[#allocation7] sm:$0xff]  ;;  %v569_v30 = vshrl.u32 %v568_v29, 7  ;;  %p949_p12 = pnand %p948_p1, %p942_p5 }
  0x64   : > { %587 = vmatpush1.msra.mxu1 %v524_v32  ;;  %v565_v55 = vld [vmem:[#allocation7 + $0x1f8] sm:$0xff]  ;;  %v564_v56 = vld [vmem:[#allocation7 + $0x1f0] sm:$0xff]  ;;  %v563_v57 = vld [vmem:[#allocation7 + $0x1e8] sm:$0xff] }
  0x65   : > { %588 = vmatprep.subr.mxu1 %v523_v33  ;;  %v562_v58 = vld [vmem:[#allocation7 + $0x1e0] sm:$0xff]  ;;  %v561_v59 = vld [vmem:[#allocation7 + $0x1d8] sm:$0xff]  ;;  %v560_v60 = vld [vmem:[#allocation7 + $0x1d0] sm:$0xff]  ;;  %v570_v31 = vsub.s32 0, %v569_v30  ;;  %v574_v32 = vsub.s32 1, %v569_v30 }
  0x66   : > { %589 = vmatpush1.msra.mxu1 %v522_v34  ;;  %v559_v61 = vld [vmem:[#allocation7 + $0x1c8] sm:$0xff]  ;;  %v558_v62 = vld [vmem:[#allocation7 + $0x1c0] sm:$0xff]  ;;  %v557_v63 = vld [vmem:[#allocation7 + $0x1b8] sm:$0xff] }
  0x67   : > { %590 = vmatprep.subr.mxu1 %v521_v35  ;;  %v555_v1 = vld [vmem:[#allocation7 + $0x1a8] sm:$0xff]  ;;  %v554_v2 = vld [vmem:[#allocation7 + $0x1a0] sm:$0xff]  ;;  %v553_v3 = vld [vmem:[#allocation7 + $0x198] sm:$0xff] }
  0x68   : > { %591 = vmatpush1.msra.mxu1 %v520_v36  ;;  %v552_v4 = vld [vmem:[#allocation7 + $0x190] sm:$0xff]  ;;  %v551_v5 = vld [vmem:[#allocation7 + $0x188] sm:$0xff]  ;;  %v550_v6 = vld [vmem:[#allocation7 + $0x180] sm:$0xff] }
  0x69   : > { %592 = vmatprep.subr.mxu1 %v519_v37  ;;  %v549_v7 = vld [vmem:[#allocation7 + $0x178] sm:$0xff]  ;;  %v548_v8 = vld [vmem:[#allocation7 + $0x170] sm:$0xff]  ;;  %v547_v9 = vld [vmem:[#allocation7 + $0x168] sm:$0xff] }
  0x6a   : > { %593 = vmatpush1.msra.mxu1 %v518_v38  ;;  %v546_v10 = vld [vmem:[#allocation7 + $0x160] sm:$0xff]  ;;  %v545_v11 = vld [vmem:[#allocation7 + $0x158] sm:$0xff]  ;;  %v536_v24 = vld [vmem:[#allocation7 + $0x110] sm:$0xff] }
  0x6b   : > { %594 = vmatprep.subr.mxu1 %v517_v39  ;;  %v537_v23 = vld [vmem:[#allocation7 + $0x118] sm:$0xff]  ;;  %v535_v25 = vld [vmem:[#allocation7 + $0x108] sm:$0xff]  ;;  %v534_v26 = vld [vmem:[#allocation7 + $0x100] sm:$0xff] }
  0x6c   : > { %595 = vmatpush1.msra.mxu1 %v516_v40 }
  0x6d   : > { %596 = vmatprep.subr.mxu1 %v515_v41 }
  0x6e   : > { %597 = vmatpush1.msra.mxu1 %v514_v42 }
  0x6f   : > { %598 = vmatprep.subr.mxu1 %v513_v43 }
  0x70   : > { %599 = vmatpush1.msra.mxu1 %v512_v44 }
  0x71   : > { %600 = vmatprep.subr.mxu1 %v511_v45 }
  0x72   : > { %601 = vmatpush1.msra.mxu1 %v510_v46 }
  0x73   : > { %602 = vmatprep.subr.mxu1 %v509_v47 }
  0x74   : > { %603 = vmatpush1.msra.mxu1 %v508_v48 }
  0x75   : > { %604 = vmatprep.subr.mxu1 %v507_v49 }
  0x76   : > { %605 = vmatpush1.msra.mxu1 %v506_v50 }
  0x77   : > { %606 = vmatprep.subr.mxu1 %v505_v51 }
  0x78   : > { %607 = vmatpush1.msra.mxu1 %v504_v52 }
  0x79   : > { %608 = vmatprep.subr.mxu1 %v503_v53 }
  0x7a   : > { %609 = vmatpush1.msra.mxu1 %v502_v54 }
  0x7b   : > { %610 = vmatprep.subr.mxu1 %v565_v55 }
  0x7c   : > { %611 = vmatpush2.msra.mxu1 %v564_v56 }
  0x7d   : > { %612 = vmatprep.subr.mxu1 %v563_v57 }
  0x7e   : > { %613 = vmatpush2.msra.mxu1 %v562_v58 }
  0x7f   : > { %614 = vmatprep.subr.mxu1 %v561_v59 }
  0x80   : > { %615 = vmatpush2.msra.mxu1 %v560_v60 }
  0x81   : > { %616 = vmatprep.subr.mxu1 %v559_v61 }
  0x82   : > { %617 = vmatpush2.msra.mxu1 %v558_v62 }
  0x83   : > { %618 = vmatprep.subr.mxu1 %v557_v63 }
 0x120   : > { %v332_v12 = vpop.f32.mrf.mxu0 }
 0x122   : > { %v334_v13 = vpop.f32.mrf.mxu0 }
 0x123   : > { %367 = vmatprep.subr.mxu0 %v334_v13  ;;  %401 = vmatprep.mubr.f32.mxu0 %v334_v13 }
 0x124   : > { %368 = vmatpush1.xpose.msra.mxu0 %v332_v12 }
 0x125   : > { %772 = vmatprep.subr.msk.mxu0 %vm424_vm2, %v334_v13  ;;  %v543_v13 = vld [vmem:[#allocation7 + $0x148] sm:$0xff] }
 0x127   : > { %402 = vmatmul.mubr.f32.vlgmr.msra.gmra.mxu0 %v332_v12 }
 0x128   : > { %773 = vmatpush1.msk.msra.mxu0 %vm424_vm2, %v332_v12  ;;  %495 = vmatprep.mubr.f32.mxu0 %v1015_v0  ;;  %v556_v0 = vld [vmem:[#allocation7 + $0x1b0] sm:$0xff] }
 0x129   : > { %619 = vmatpush2.msra.mxu1 %v556_v0  ;;  %v544_v12 = vld [vmem:[#allocation7 + $0x150] sm:$0xff] }
 0x12a   : > { %620 = vmatprep.subr.mxu1 %v555_v1 }
 0x12b   : > { %621 = vmatpush2.msra.mxu1 %v554_v2 }
 0x12c   : > { %622 = vmatprep.subr.mxu1 %v553_v3 }
 0x12d   : > { %623 = vmatpush2.msra.mxu1 %v552_v4 }
 0x12e   : > { %624 = vmatprep.subr.mxu1 %v551_v5 }
 0x12f   : > { %625 = vmatpush2.msra.mxu1 %v550_v6 }
 0x130   : > { %626 = vmatprep.subr.mxu1 %v549_v7 }
 0x131   : > { %627 = vmatpush2.msra.mxu1 %v548_v8 }
 0x132   : > { %628 = vmatprep.subr.mxu1 %v547_v9 }
 0x133   : > { %629 = vmatpush2.msra.mxu1 %v546_v10 }
 0x134   : > { %630 = vmatprep.subr.mxu1 %v545_v11 }
 0x135   : > { %631 = vmatpush2.msra.mxu1 %v544_v12 }
 0x136   : > { %632 = vmatprep.subr.mxu1 %v543_v13 }
 0x1e7   : > { %v403_v14 = vpop.f32.mrf.mxu0 }
 0x1e8   : > { %v407_v15 = vmul.f32 0.0625, %v403_v14  ;;  %v542_v14 = vld [vmem:[#allocation7 + $0x140] sm:$0xff] }
 0x1e9   : > { %v405_v16 = vpop.f32.mrf.mxu0  ;;  %633 = vmatpush2.msra.mxu1 %v542_v14 }
 0x1ea   : > { %v409_v17 = vsel %vm408_vm3, %v407_v15, -inf  ;;  %v540_v16 = vld [vmem:[#allocation7 + $0x130] sm:$0xff] }
 0x1eb   : > { %410 = vmax.xlane.f32.xlu0 %v409_v17  ;;  %v539_v17 = vld [vmem:[#allocation7 + $0x128] sm:$0xff] }
 0x274   : > { %v411_v18 = vpop.xlane.xlu0 %410 }
 0x275   : > { %v412_v19 = vsub.f32 %v407_v15, %v411_v18  ;;  %v541_v15 = vld [vmem:[#allocation7 + $0x138] sm:$0xff]  ;;  %v538_v18 = vld [vmem:[#allocation7 + $0x120] sm:$0xff] }
 0x276   : > { %634 = vmatprep.subr.mxu1 %v541_v15 }
 0x277   : > { %v413_v20 = vmul.f32 1.442695, %v412_v19  ;;  %635 = vmatpush2.msra.mxu1 %v540_v16 }
 0x278   : > { %636 = vmatprep.subr.mxu1 %v539_v17 }
 0x279   : > { %855 = vpow2.f32 %v413_v20  ;;  %637 = vmatpush2.msra.mxu1 %v538_v18 }
 0x27a   : > { %638 = vmatprep.subr.mxu1 %v537_v23 }
 0x27b   : > { %639 = vmatpush2.msra.mxu1 %v536_v24 }
 0x27c   : > { %640 = vmatprep.subr.mxu1 %v535_v25 }
 0x27d   : > { %641 = vmatpush2.msra.mxu1 %v534_v26 }
 0x286   : > { %v1190_v21 = vpop.eup %855 }
 0x287   : > { %v415_v22 = vsel %vm408_vm3, %v1190_v21, 0.0 }
 0x288   : > { %416 = vadd.xlane.f32.xlu0 %v415_v22 }
 0x311   : > { %v417_v19 = vpop.xlane.xlu0 %416 }
 0x312   : > { %857 = vrcp.f32 %v417_v19 }
 0x31f   : > { %v858_v20 = vpop.eup %857 }
 0x320   : > { %v419_v22 = vmul.f32 %v858_v20, %v1190_v21  ;;  %v566_v21 = vld [vmem:[%s1236_s3] sm:$0x3] }
 0x321   : > { %v571_v33 = vrot.slane %v566_v21, %v570_v31  ;;  %v575_v34 = vrot.slane %v566_v21, %v574_v32 }
 0x322   : > { %774 = vmatmul.mubr.msk.f32.vlgmr.msra.gmra.mxu0 %vm420_vm4, %v419_v22 }
 0x3e2   : > { %v497_v27 = vpop.f32.mrf.mxu0 }
 0x3e4   : > { %v499_v28 = vpop.f32.mrf.mxu0 }
 0x3e5   : > { %642 = vmatprep.mubr.f32.mxu1 %v499_v28 }
 0x3e6   : > { %643 = vmatmul.mubr.f32.vlgmr.msra.gmra.mxu1 %v497_v27 }
 0x4a6   : > { %v644_v35 = vpop.f32.mrf.mxu1 }
 0x4a7   : > { %v645_v37 = vadd.f32 %v644_v35, %v571_v33 }
 0x4a8   : > { %v646_v36 = vpop.f32.mrf.mxu1 }
 0x4a9   : > { %v647_v38 = vadd.f32 %v646_v36, %v575_v34 }
 0x4ab   : > { %v651_v39 = vcombine.low %v645_v37, %v647_v38 }
 0x4ad   : > { %653 = vst [vmem:[%s242_s22] sm:$0xff] %v651_v39 }
 0x4ae   : > { %952 = shalt.err (!%p949_p12)
}
 0x4af   : > { %s953_s1 = scalar_lea.hbm %s667_s8, 128  ;;  %s957_s25 = scalar_lea.hbm %s1237_s4, 256 }
 0x4b0   : > { %p954_p6 = scmp.ne.s32.totalorder %s667_s8, %s953_s1  ;;  %p958_p13 = scmp.lt.s32.totalorder %s667_s8, %s1237_s4 }
 0x4b1   : > { %p959_p8 = scmp.lt.s32.totalorder %s957_s25, %s953_s1 }
 0x4b2   : > { %p955_p7 = pnand %p954_p6, %p1256_p0 }
 0x4b3   : > { %p960_p3 = por %p959_p8, %p958_p13 }
 0x4b4   : > { %p956_p11 = pneg %p955_p7 }
 0x4b6   : > { %p961_p2 = pnand %p960_p3, %p956_p11 }
 0x4b8   : > { %964 = shalt.err (!%p961_p2)
}
 0x4b9   : > { %794 = dma.vmem_to_hbm [thread:$0]  (%p1256_p0), %s670_s11, 128, %s667_s8, %s655_s13  }
 0x4ba PF: > { %s681_s29 = sand.u32 1, %s995_s15   ;;  %p1257_p4 = scmp.ne.s32.totalorder %s1246_s28, 0 }
 0x4bb   : > { %p1258_p5 = scmp.ge.s32.totalorder %s1007_s18, 2  ;;  %s682_s7 = scalar_lea.sflag [#allocation4], %s681_s29 }
 0x4bd   : > { %p808_p9 = pnand %p1258_p5, %p1257_p4 }
 0x4bf   : > { %p809_p10 = pneg %p808_p9 }
 0x4c1   : > { %990 = dma.done.wait (%p809_p10), %s682_s7, 128  }
 0x4c2   : > { %992 = vsyncadd (%p809_p10), %s682_s7, 4294967168  ;;  %p18_p1 = scmp.ge.s32.totalorder %s1067_s21, 4   ;;  %s1259_s15 = smov %s999_s16 }
 0x4c3   : > { %s1260_s16 = smov %s1003_s17  ;;  %s1261_s17 = smov %s1079_s24 }
 0x4c4   : > { %s1262_s18 = smov %s1067_s21  ;;  %20 = sbr.rel (!%p18_p1) target bundleno = 8 (0x8), region = 89 }
 0x4c9   :  { %687 = vsyncpa [#allocation3], 1 }
 0x4ca   :  { %689 = vsyncpa [#allocation3 + $0x1], 1 }
 0x4cb   :  { %690 = vsyncpa [#allocation6], 1 }
 0x4cc   :  { %691 = vsyncpa [#allocation4], 1 }
 0x4cd   :  { %693 = vsyncpa [#allocation4 + $0x1], 1 }

</bundles_post_ra>
